<compile_context>
chip_gen: v7x
topology: tpu7x:2x2x1
jax: 0.10.0
libtpu: 0.0.40
codegen_flags: <defaults>
</compile_context>

<pallas_src>
import functools

import jax
import jax.numpy as jnp
from jax.experimental import pallas as pl
from jax.experimental.pallas import tpu as pltpu

SMOOTH = 1.0
EPS = 1e-8
_LANE = 128
_MIB = 1024 * 1024


def _round_up(v, m):
    return (v + m - 1) // m * m


@functools.lru_cache(maxsize=None)
def _vmem_capacity_bytes():
    try:
        return int(pltpu.get_tpu_info().vmem_capacity_bytes)
    except Exception:
        return 64 * _MIB  # conservative fallback: v7x has 64 MiB per TensorCore


def _sublane_footprint(rows, itemsize):
    """Sublane-padded row count of a (rows, lanes) VMEM tile for this dtype."""
    packing = max(1, 4 // itemsize)            # f32 -> 8, bf16 -> 16, int8 -> 32
    return _round_up(max(rows, 1), 8 * packing)


def _pick_tile_s(S, bytes_per_lane, budget):
    """Largest multiple-of-128 spatial tile whose working set fits `budget`."""
    s128 = _round_up(S, _LANE)
    t = (budget // max(bytes_per_lane, 1)) // _LANE * _LANE
    return max(_LANE, min(t, s128))


def _dice_label_kernel(x_ref, lab_ref, sxy_out, ssum_out, sxy_acc, ssum_acc,
                       *, n_inner, tile_s, S, mask_tail):
    """x_ref: (b, c, tile_s) activations; lab_ref: (b, 1, tile_s) int labels.
    Accumulates tp and (2tp+fp+fn) partial sums into VMEM scratch; writes the
    (1, b, c) output blocks once per outer grid step."""
    i = pl.program_id(1)

    @pl.when(i == 0)
    def _():
        sxy_acc[...] = jnp.zeros_like(sxy_acc)
        ssum_acc[...] = jnp.zeros_like(ssum_acc)

    x = x_ref[...].astype(jnp.float32)                         # (b, c, t)
    lab = lab_ref[...].astype(jnp.int32)                       # (b, 1, t)
    ci = jax.lax.broadcasted_iota(jnp.int32, x.shape, 1)       # channel index
    y_bool = lab == ci                                         # in-kernel one-hot

    if mask_tail:
        off = (pl.program_id(0) * n_inner + i) * tile_s
        pos = jax.lax.broadcasted_iota(jnp.int32, x.shape, 2) + off
        valid = pos < S
        x = jnp.where(valid, x, 0.0)           # OOB garbage (incl. NaN) -> 0
        y_bool = jnp.logical_and(y_bool, valid)

    y = y_bool.astype(jnp.float32)
    sxy_acc[...] += jnp.sum(x * y, axis=-1)                    # tp partial
    ssum_acc[...] += jnp.sum(x + y, axis=-1)                   # 2tp+fp+fn partial

    @pl.when(i == n_inner - 1)
    def _():
        sxy_out[...] = sxy_acc[...][None]
        ssum_out[...] = ssum_acc[...][None]


def _dice_onehot_kernel(x_ref, y_ref, sxy_out, ssum_out, sxy_acc, ssum_acc,
                        *, n_inner, tile_s, S, mask_tail):
    """Path used when the ground truth already has the same shape as x."""
    i = pl.program_id(1)

    @pl.when(i == 0)
    def _():
        sxy_acc[...] = jnp.zeros_like(sxy_acc)
        ssum_acc[...] = jnp.zeros_like(ssum_acc)

    x = x_ref[...].astype(jnp.float32)
    y = y_ref[...].astype(jnp.float32)

    if mask_tail:
        off = (pl.program_id(0) * n_inner + i) * tile_s
        pos = jax.lax.broadcasted_iota(jnp.int32, x.shape, 2) + off
        valid = pos < S
        x = jnp.where(valid, x, 0.0)
        y = jnp.where(valid, y, 0.0)

    sxy_acc[...] += jnp.sum(x * y, axis=-1)
    ssum_acc[...] += jnp.sum(x + y, axis=-1)

    @pl.when(i == n_inner - 1)
    def _():
        sxy_out[...] = sxy_acc[...][None]
        ssum_out[...] = ssum_acc[...][None]


@functools.partial(jax.jit, static_argnames=("tile_s_override",))
def soft_dice_loss(x, y, smooth=SMOOTH, *, tile_s_override=None):
    """Forward pass of SoftDiceLoss with default config.

    x: (b, c, h, w) net output (apply_nonlin=None -> used as-is).
    y: label map (b, h, w) or (b, 1, h, w), or one-hot of shape (b, c, h, w).
    Returns scalar loss = -mean dice over (b, c)  (batch_dice=False, do_bg=True).
    """
    # TODO(synk): loss_mask (optional valid-pixel mask) is not supported in the kernel path.
    b, c, h, w = x.shape
    S = h * w

    if y.ndim == x.ndim - 1:
        y = y[:, None]
    # Matches the PyTorch module: gt with the same shape as x is treated as
    # already-one-hot; anything else is a label map.  NOTE (as in the
    # reference): a (b, 1, h, w) label map is misclassified when c == 1.
    is_label = tuple(y.shape) != tuple(x.shape)

    x3 = x.reshape(b, c, S)
    x_item = jnp.dtype(x.dtype).itemsize

    # Generation-aware VMEM budgets with an explicit compiler limit:
    #   v5e/v6e (128 MiB physical): 48 MiB of blocks+temps, ~104 MiB limit.
    #   v7x (64 MiB per TC):        32 MiB of blocks+temps, ~56 MiB limit.
    vmem_cap = _vmem_capacity_bytes()
    tile_budget = min(vmem_cap // 2, 48 * _MIB)
    vmem_limit = int(min(vmem_cap - 8 * _MIB, 2 * tile_budget + 8 * _MIB))

    # f32 in-kernel temporaries (x, one-hot/y, iota, x*y, x+y, mask), per lane.
    temps_per_lane = 6 * b * _round_up(c, 8) * 4
    x_per_lane = b * _sublane_footprint(c, x_item) * x_item

    if is_label:
        lab = y[:, 0].reshape(b, 1, S)
        if jnp.issubdtype(lab.dtype, jnp.floating):
            lab = lab.astype(jnp.int32)        # rare path; kernel needs ints
        lab_item = jnp.dtype(lab.dtype).itemsize
        second = lab
        second_per_lane = b * _sublane_footprint(1, lab_item) * lab_item
        second_hbm_bytes = b * S * lab_item
    else:
        second = y.reshape(b, c, S)            # no wrapper cast; kernel casts per tile
        y_item = jnp.dtype(second.dtype).itemsize
        second_per_lane = b * _sublane_footprint(c, y_item) * y_item
        second_hbm_bytes = b * c * S * y_item

    bytes_per_lane = 2 * (x_per_lane + second_per_lane) + temps_per_lane
    if tile_s_override is not None:
        tile_s = max(_LANE, (int(tile_s_override) // _LANE) * _LANE)
        tile_s = min(tile_s, _round_up(S, _LANE))
    else:
        tile_s = _pick_tile_s(S, bytes_per_lane, tile_budget)

    n_tiles = (S + tile_s - 1) // tile_s
    if n_tiles >= 2:
        n_outer, n_inner = 2, (n_tiles + 1) // 2   # always use both TCs on v7x
    else:
        n_outer, n_inner = 1, 1
    has_phantom = n_outer * n_inner != n_tiles
    mask_tail = (S % tile_s != 0) or has_phantom
    last_block = n_tiles - 1

    if has_phantom:
        # Phantom tile re-reads the last real block (clamped index); its
        # contribution is zeroed by the in-kernel tail mask.
        def data_idx(o, i):
            return (0, 0, jnp.minimum(o * n_inner + i, last_block))
    else:
        def data_idx(o, i):
            return (0, 0, o * n_inner + i)

    x_spec = pl.BlockSpec((b, c, tile_s), data_idx)
    if is_label:
        second_spec = pl.BlockSpec((b, 1, tile_s), data_idx)
        kernel = functools.partial(_dice_label_kernel, n_inner=n_inner,
                                   tile_s=tile_s, S=S, mask_tail=mask_tail)
    else:
        second_spec = pl.BlockSpec((b, c, tile_s), data_idx)
        kernel = functools.partial(_dice_onehot_kernel, n_inner=n_inner,
                                   tile_s=tile_s, S=S, mask_tail=mask_tail)

    out_spec = pl.BlockSpec((1, b, c), lambda o, i: (o, 0, 0))
    out_shape = (jax.ShapeDtypeStruct((n_outer, b, c), jnp.float32),
                 jax.ShapeDtypeStruct((n_outer, b, c), jnp.float32))

    cost = pl.CostEstimate(
        flops=3 * b * c * S,
        transcendentals=0,
        bytes_accessed=b * c * S * x_item + second_hbm_bytes + 2 * n_outer * b * c * 4,
    )

    part_xy, part_sum = pl.pallas_call(
        kernel,
        out_shape=out_shape,
        grid_spec=pltpu.PrefetchScalarGridSpec(
            num_scalar_prefetch=0,
            grid=(n_outer, n_inner),
            in_specs=[x_spec, second_spec],
            out_specs=[out_spec, out_spec],
            scratch_shapes=[pltpu.VMEM((b, c), jnp.float32),
                            pltpu.VMEM((b, c), jnp.float32)]),
        compiler_params=pltpu.CompilerParams(
            dimension_semantics=("parallel", "arbitrary"),
            vmem_limit_bytes=vmem_limit),
        cost_estimate=cost,
    )(x3, second)

    # Tiny finalize in plain JAX: dice ratio over (b, c) and mean.
    sxy = jnp.sum(part_xy, axis=0)      # tp                    (b, c)
    ssum = jnp.sum(part_sum, axis=0)    # 2*tp + fp + fn        (b, c)
    nominator = 2.0 * sxy + smooth
    denominator = ssum + smooth
    dc = nominator / (denominator + EPS)    # do_bg=True keeps all channels
    return -jnp.mean(dc)


def _soft_dice_loss_ref(x, y, smooth=SMOOTH):
    """Pure-JAX reference mirroring the PyTorch forward (defaults)."""
    b, c, h, w = x.shape
    if y.ndim == x.ndim - 1:
        y = y[:, None]
    if y.shape != x.shape:
        y = jax.nn.one_hot(y[:, 0].astype(jnp.int32), c, axis=1, dtype=jnp.float32)
    x = x.astype(jnp.float32)
    y = y.astype(jnp.float32)
    axes = (2, 3)
    tp = jnp.sum(x * y, axis=axes)
    fp = jnp.sum(x * (1.0 - y), axis=axes)
    fn = jnp.sum((1.0 - x) * y, axis=axes)
    nominator = 2.0 * tp + smooth
    denominator = 2.0 * tp + fp + fn + smooth
    dc = nominator / (denominator + EPS)
    return -jnp.mean(dc)


if __name__ == "__main__":
    key = jax.random.PRNGKey(0)
    k1, k2, k3, k4 = jax.random.split(key, 4)
    b, c, h, w = 2, 4, 16, 16

    # Net output in [0, 1] (as if a sigmoid/softmax was already applied upstream).
    x = jax.random.uniform(k1, (b, c, h, w), dtype=jnp.float32)
    # Ground-truth label map (b, h, w) -> one-hot built inside the kernel.
    y_lab = jax.random.randint(k2, (b, h, w), 0, c).astype(jnp.int32)

    loss = jax.block_until_ready(soft_dice_loss(x, y_lab))
    ref = _soft_dice_loss_ref(x, y_lab)
    assert jnp.allclose(loss, ref, atol=1e-5, rtol=1e-5), (loss, ref)

    # Already-one-hot ground-truth path.
    y_oh = jax.nn.one_hot(y_lab, c, axis=1, dtype=x.dtype)
    loss2 = jax.block_until_ready(soft_dice_loss(x, y_oh))
    ref2 = _soft_dice_loss_ref(x, y_oh)
    assert jnp.allclose(loss2, ref2, atol=1e-5, rtol=1e-5), (loss2, ref2)

    # Ragged spatial size + forced small tiles: exercises the in-kernel tail
    # mask, the forced 2-way split, and the phantom-tile clamp (n_tiles odd).
    h2 = w2 = 24                                   # S = 576, tile 128 -> 5 tiles
    x_r = jax.random.uniform(k3, (b, c, h2, w2), dtype=jnp.float32)
    y_r = jax.random.randint(k4, (b, h2, w2), 0, c).astype(jnp.int32)
    loss3 = jax.block_until_ready(soft_dice_loss(x_r, y_r, tile_s_override=128))
    ref3 = _soft_dice_loss_ref(x_r, y_r)
    assert jnp.allclose(loss3, ref3, atol=1e-5, rtol=1e-5), (loss3, ref3)

    print("KERNEL_OK")
</pallas_src>

<mosaic_0001>
module attributes {stable_mosaic.version = 11 : i64} {
  func.func @_dice_label_kernel(%arg0: i32, %arg1: i32, %arg2: memref<2x4x256xf32, #tpu.memory_space<vmem>>, %arg3: memref<2x1x256xi32, #tpu.memory_space<vmem>>, %arg4: memref<1x2x4xf32, #tpu.memory_space<vmem>>, %arg5: memref<1x2x4xf32, #tpu.memory_space<vmem>>, %arg6: memref<2x4xf32, #tpu.memory_space<vmem>>, %arg7: memref<2x4xf32, #tpu.memory_space<vmem>>) attributes {dimension_semantics = [#tpu.dimension_semantics<parallel>, #tpu.dimension_semantics<arbitrary>], iteration_bounds = array<i64: 1, 1>, scalar_prefetch = 0 : i64, scratch_operands = 2 : i64, tpu.core_type = #tpu.core_type<tc>, window_params = [{transform_indices = @transform_0, window_bounds = array<i64: 2, 4, 256>}, {transform_indices = @transform_1, window_bounds = array<i64: 2, 1, 256>}, {transform_indices = @transform_2, window_bounds = array<i64: 1, 2, 4>}, {transform_indices = @transform_3, window_bounds = array<i64: 1, 2, 4>}]} {
    %c0_i32 = arith.constant 0 : i32
    %0 = arith.cmpi eq, %arg1, %c0_i32 : i32
    %1 = arith.extui %0 : i1 to i32
    %c0_i32_0 = arith.constant 0 : i32
    %2 = arith.cmpi ne, %1, %c0_i32_0 : i32
    scf.if %2 {
      %cst_17 = arith.constant 0.000000e+00 : f32
      %23 = vector.broadcast %cst_17 : f32 to vector<2x4xf32>
      %c0_18 = arith.constant 0 : index
      %c0_19 = arith.constant 0 : index
      %24 = vector.load %arg6[%c0_18, %c0_19] : memref<2x4xf32, #tpu.memory_space<vmem>>, vector<2x4xf32>
      tpu.vector_store %arg6[%c0_18, %c0_19], %23 {strides = array<i32>} : memref<2x4xf32, #tpu.memory_space<vmem>>, vector<2x4xf32>,
      %cst_20 = arith.constant 0.000000e+00 : f32
      %25 = vector.broadcast %cst_20 : f32 to vector<2x4xf32>
      %c0_21 = arith.constant 0 : index
      %c0_22 = arith.constant 0 : index
      %26 = vector.load %arg7[%c0_21, %c0_22] : memref<2x4xf32, #tpu.memory_space<vmem>>, vector<2x4xf32>
      tpu.vector_store %arg7[%c0_21, %c0_22], %25 {strides = array<i32>} : memref<2x4xf32, #tpu.memory_space<vmem>>, vector<2x4xf32>,
    } else {
    }
    %c0 = arith.constant 0 : index
    %c0_1 = arith.constant 0 : index
    %c0_2 = arith.constant 0 : index
    %3 = vector.load %arg2[%c0, %c0_1, %c0_2] : memref<2x4x256xf32, #tpu.memory_space<vmem>>, vector<2x4x256xf32>
    %c0_3 = arith.constant 0 : index
    %c0_4 = arith.constant 0 : index
    %c0_5 = arith.constant 0 : index
    %4 = vector.load %arg3[%c0_3, %c0_4, %c0_5] : memref<2x1x256xi32, #tpu.memory_space<vmem>>, vector<2x1x256xi32>
    %5 = tpu.iota {dimensions = array<i32: 1>} : vector<2x4x256xi32>
    %6 = vector.broadcast %4 : vector<2x1x256xi32> to vector<2x4x256xi32>
    %7 = arith.cmpi eq, %6, %5 : vector<2x4x256xi32>
    %8 = arith.extui %7 : vector<2x4x256xi1> to vector<2x4x256xi32>
    %9 = arith.sitofp %8 : vector<2x4x256xi32> to vector<2x4x256xf32>
    %c0_6 = arith.constant 0 : index
    %c0_7 = arith.constant 0 : index
    %10 = vector.load %arg6[%c0_6, %c0_7] : memref<2x4xf32, #tpu.memory_space<vmem>>, vector<2x4xf32>
    %11 = arith.mulf %3, %9 : vector<2x4x256xf32>
    %cst = arith.constant dense<0.000000e+00> : vector<2x4xf32>
    %12 = vector.multi_reduction <add>, %11, %cst [2] : vector<2x4x256xf32> to vector<2x4xf32>
    %13 = arith.addf %10, %12 : vector<2x4xf32>
    %c0_8 = arith.constant 0 : index
    %c0_9 = arith.constant 0 : index
    %14 = vector.load %arg6[%c0_8, %c0_9] : memref<2x4xf32, #tpu.memory_space<vmem>>, vector<2x4xf32>
    tpu.vector_store %arg6[%c0_8, %c0_9], %13 {strides = array<i32>} : memref<2x4xf32, #tpu.memory_space<vmem>>, vector<2x4xf32>,
    %c0_10 = arith.constant 0 : index
    %c0_11 = arith.constant 0 : index
    %15 = vector.load %arg7[%c0_10, %c0_11] : memref<2x4xf32, #tpu.memory_space<vmem>>, vector<2x4xf32>
    %16 = arith.addf %3, %9 : vector<2x4x256xf32>
    %cst_12 = arith.constant dense<0.000000e+00> : vector<2x4xf32>
    %17 = vector.multi_reduction <add>, %16, %cst_12 [2] : vector<2x4x256xf32> to vector<2x4xf32>
    %18 = arith.addf %15, %17 : vector<2x4xf32>
    %c0_13 = arith.constant 0 : index
    %c0_14 = arith.constant 0 : index
    %19 = vector.load %arg7[%c0_13, %c0_14] : memref<2x4xf32, #tpu.memory_space<vmem>>, vector<2x4xf32>
    tpu.vector_store %arg7[%c0_13, %c0_14], %18 {strides = array<i32>} : memref<2x4xf32, #tpu.memory_space<vmem>>, vector<2x4xf32>,
    %c0_i32_15 = arith.constant 0 : i32
    %20 = arith.cmpi eq, %arg1, %c0_i32_15 : i32
    %21 = arith.extui %20 : i1 to i32
    %c0_i32_16 = arith.constant 0 : i32
    %22 = arith.cmpi ne, %21, %c0_i32_16 : i32
    scf.if %22 {
      %c0_17 = arith.constant 0 : index
      %c0_18 = arith.constant 0 : index
      %23 = vector.load %arg6[%c0_17, %c0_18] : memref<2x4xf32, #tpu.memory_space<vmem>>, vector<2x4xf32>
      %24 = vector.shape_cast %23 : vector<2x4xf32> to vector<1x2x4xf32>
      %c0_19 = arith.constant 0 : index
      %c0_20 = arith.constant 0 : index
      %c0_21 = arith.constant 0 : index
      %25 = vector.load %arg4[%c0_19, %c0_20, %c0_21] : memref<1x2x4xf32, #tpu.memory_space<vmem>>, vector<1x2x4xf32>
      tpu.vector_store %arg4[%c0_19, %c0_20, %c0_21], %24 {strides = array<i32>} : memref<1x2x4xf32, #tpu.memory_space<vmem>>, vector<1x2x4xf32>,
      %c0_22 = arith.constant 0 : index
      %c0_23 = arith.constant 0 : index
      %26 = vector.load %arg7[%c0_22, %c0_23] : memref<2x4xf32, #tpu.memory_space<vmem>>, vector<2x4xf32>
      %27 = vector.shape_cast %26 : vector<2x4xf32> to vector<1x2x4xf32>
      %c0_24 = arith.constant 0 : index
      %c0_25 = arith.constant 0 : index
      %c0_26 = arith.constant 0 : index
      %28 = vector.load %arg5[%c0_24, %c0_25, %c0_26] : memref<1x2x4xf32, #tpu.memory_space<vmem>>, vector<1x2x4xf32>
      tpu.vector_store %arg5[%c0_24, %c0_25, %c0_26], %27 {strides = array<i32>} : memref<1x2x4xf32, #tpu.memory_space<vmem>>, vector<1x2x4xf32>,
    } else {
    }
    return
  }
  func.func @transform_0(%arg0: i32, %arg1: i32) -> (i32, i32, i32) {
    %c1_i32 = arith.constant 1 : i32
    %0 = arith.muli %arg0, %c1_i32 : i32
    %1 = arith.addi %0, %arg1 : i32
    %c0_i32 = arith.constant 0 : i32
    %c0_i32_0 = arith.constant 0 : i32
    %c0_i32_1 = arith.constant 0 : i32
    return %c0_i32, %c0_i32_0, %1 : i32, i32, i32
  }
  func.func @transform_1(%arg0: i32, %arg1: i32) -> (i32, i32, i32) {
    %c1_i32 = arith.constant 1 : i32
    %0 = arith.muli %arg0, %c1_i32 : i32
    %1 = arith.addi %0, %arg1 : i32
    %c0_i32 = arith.constant 0 : i32
    %c0_i32_0 = arith.constant 0 : i32
    %c0_i32_1 = arith.constant 0 : i32
    return %c0_i32, %c0_i32_0, %1 : i32, i32, i32
  }
  func.func @transform_2(%arg0: i32, %arg1: i32) -> (i32, i32, i32) {
    %c0_i32 = arith.constant 0 : i32
    %c0_i32_0 = arith.constant 0 : i32
    %c0_i32_1 = arith.constant 0 : i32
    return %arg0, %c0_i32, %c0_i32_0 : i32, i32, i32
  }
  func.func @transform_3(%arg0: i32, %arg1: i32) -> (i32, i32, i32) {
    %c0_i32 = arith.constant 0 : i32
    %c0_i32_0 = arith.constant 0 : i32
    %c0_i32_1 = arith.constant 0 : i32
    return %arg0, %c0_i32, %c0_i32_0 : i32, i32, i32
  }
}

</mosaic_0001>

<bundles_post_ra>
// kernel: soft_dice_loss.1
= control target key start
LH: loop header
LB: loop body
LE: loop exit
PB: predicated region body
PF: predicated region fallthrough
CT: control target
= control target key end

     0   :  { %v65_v0 = vlaneseq  ;;  %v203_v13 = vmov 0.0   ;;  %vm112_vm4 = vcmask 1043456   ;;  %vm58_vm5 = vcmask 25600   ;;  %s256_s1 = inlined_call_operand.vmem [shape: s32[2,1,256], index: 1, kind: input, shape index: {}]   ;;  %s257_s0 = inlined_call_operand.vmem [shape: f32[2,4,256], index: 0, kind: input, shape index: {}]   ;;  %s258_s3 = inlined_call_operand.vmem [shape: f32[1,2,4], index: 3, kind: output, shape index: {1}]   ;;  %s259_s2 = inlined_call_operand.vmem [shape: f32[1,2,4], index: 2, kind: output, shape index: {0}]  }
   0x1   :  { %v63_v3 = vld [vmem:[%s256_s1] sm:$0x3]  ;;  %v64_v4 = vld [vmem:[%s256_s1 + $0x2] sm:$0x3]  ;;  %v62_v16 = vld [vmem:[%s257_s0 + $0x8] sm:$0xff]  ;;  %vm135_vm6 = vcmask 1041409  }
   0x2   :  { %v66_v1 = vshrl.u32 %v65_v0, 7  ;;  %v126_v2 = vand.u32 127, %v65_v0  ;;  %v61_v12 = vld [vmem:[%s257_s0] sm:$0xff]  ;;  %60 = vst.msk [vmem:[#allocation3] sm:$0x3] %vm58_vm5, %v203_v13 }
   0x3   :  { %59 = vst.msk [vmem:[#allocation2] sm:$0x3] %vm58_vm5, %v203_v13 }
   0x4   :  { %v69_v5 = vsub.s32 0, %v66_v1  ;;  %v73_v6 = vsub.s32 1, %v66_v1  ;;  %v129_v7 = vsub.s32 %v126_v2, %v66_v1 }
   0x6   :  { %v70_v8 = vrot.slane %v63_v3, %v69_v5  ;;  %v74_v9 = vrot.slane %v63_v3, %v73_v6  ;;  %v78_v10 = vrot.slane %v64_v4, %v69_v5  ;;  %v82_v11 = vrot.slane %v64_v4, %v73_v6 }
   0x8   :  { %vm83_vm0 = vcmp.eq.s32.totalorder %v70_v8, %v66_v1  ;;  %vm84_vm1 = vcmp.eq.s32.totalorder %v74_v9, %v66_v1  ;;  %vm85_vm2 = vcmp.eq.s32.totalorder %v78_v10, %v66_v1  ;;  %vm86_vm3 = vcmp.eq.s32.totalorder %v82_v11, %v66_v1 }
   0x9   :  { %v198_v14 = vsel %vm83_vm0, 1.0, %v203_v13  ;;  %v199_v15 = vsel %vm84_vm1, 1.0, %v203_v13  ;;  %v200_v17 = vsel %vm85_vm2, 1.0, %v203_v13  ;;  %v201_v18 = vsel %vm86_vm3, 1.0, %v203_v13  ;;  %v141_v47 = vld [vmem:[#allocation3] sm:$0x3] }
   0xa   :  { %v100_v19 = vcombine.low %v198_v14, %v199_v15  ;;  %v101_v20 = vcombine.low %v200_v17, %v201_v18  ;;  %v95_v49 = vld [vmem:[#allocation2] sm:$0x3] }
   0xc   :  { %v142_v21 = vadd.f32 %v100_v19, %v61_v12  ;;  %v104_v22 = vmul.f32 %v100_v19, %v61_v12  ;;  %v143_v23 = vadd.f32 %v101_v20, %v62_v16  ;;  %v105_v24 = vmul.f32 %v101_v20, %v62_v16 }
   0xe   :  { %v146_v25 = vcombine.high %v142_v21, %v142_v21  ;;  %v150_v26 = vsel %vm112_vm4, %v142_v21, 0.0  ;;  %v108_v27 = vcombine.high %v104_v22, %v104_v22  ;;  %v113_v28 = vsel %vm112_vm4, %v104_v22, 0.0 }
   0xf   :  { %v147_v29 = vcombine.high %v143_v23, %v143_v23  ;;  %v109_v30 = vcombine.high %v105_v24, %v105_v24  ;;  %v155_v33 = vsel %vm112_vm4, %v143_v23, 0.0  ;;  %v118_v34 = vsel %vm112_vm4, %v105_v24, 0.0 }
  0x10   :  { %v151_v31 = vsel %vm112_vm4, %v146_v25, 0.0  ;;  %v114_v32 = vsel %vm112_vm4, %v108_v27, 0.0 }
  0x11   :  { %v152_v35 = vadd.f32 %v151_v31, %v150_v26  ;;  %v115_v36 = vadd.f32 %v114_v32, %v113_v28  ;;  %v156_v37 = vsel %vm112_vm4, %v147_v29, 0.0  ;;  %v119_v38 = vsel %vm112_vm4, %v109_v30, 0.0 }
  0x12   :  { %v157_v39 = vadd.f32 %v156_v37, %v155_v33  ;;  %v120_v40 = vadd.f32 %v119_v38, %v118_v34 }
  0x13   :  { %153 = vadd.xlane.f32.xlu1 %v152_v35  ;;  %116 = vadd.xlane.f32.xlu0 %v115_v36 }
  0x17   :  { %158 = vadd.xlane.f32.xlu1 %v157_v39  ;;  %121 = vadd.xlane.f32.xlu0 %v120_v40 }
  0xa0   :  { %v154_v41 = vpop.xlane.xlu1 %153  ;;  %v117_v42 = vpop.xlane.xlu0 %116 }
  0xa1   :  { %v165_v45 = vrot.slane %v154_v41, %v129_v7  ;;  %v130_v46 = vrot.slane %v117_v42, %v129_v7 }
  0xa4   :  { %v159_v43 = vpop.xlane.xlu1 %158  ;;  %v122_v44 = vpop.xlane.xlu0 %121 }
  0xa5   :  { %v169_v48 = vrot.slane %v159_v43, %v129_v7  ;;  %v134_v50 = vrot.slane %v122_v44, %v129_v7 }
  0xa7   :  { %v170_v51 = vsel %vm135_vm6, %v169_v48, %v165_v45  ;;  %v136_v52 = vsel %vm135_vm6, %v134_v50, %v130_v46 }
  0xa8   :  { %v172_v53 = vadd.f32 %v170_v51, %v141_v47  ;;  %v138_v54 = vadd.f32 %v136_v52, %v95_v49 }
  0xaa   :  { %173 = vst.msk [vmem:[#allocation3] sm:$0x3] %vm58_vm5, %v172_v53  ;;  %140 = vst.msk [vmem:[#allocation2] sm:$0x3] %vm58_vm5, %v138_v54 }
  0xb1   :  { %v179_v55 = vld [vmem:[#allocation3] sm:$0x3]  ;;  %v177_v56 = vld [vmem:[#allocation2] sm:$0x3] }
  0xb2   :  { %180 = vst.msk [vmem:[%s258_s3] sm:$0x3] %vm58_vm5, %v179_v55  ;;  %178 = vst.msk [vmem:[%s259_s2] sm:$0x3] %vm58_vm5, %v177_v56 }

</bundles_post_ra>
